<compile_context>
chip_gen: v7x
topology: tpu7x:2x2x1
jax: 0.10.0
libtpu: 0.0.40
codegen_flags: <defaults>
</compile_context>

<pallas_src>
import functools

import jax
import jax.numpy as jnp
from jax import lax
from jax.experimental import pallas as pl
from jax.experimental.pallas import tpu as pltpu

EPS = 1e-5


def _basic_block_kernel(x_ref, b1_ref, b2_ref, pool_ref, bcast_ref,
                        g1_ref, be1_ref, g2_ref, be2_ref,
                        mup_ref, mdn_ref, out_ref, *, compute_dtype):
    R, WC = x_ref.shape            # R = N*H rows, WC = W*C lanes (lane-dense folded layout)
    C = g1_ref.shape[1]
    W = WC // C
    inv_cnt = 1.0 / float(R * W)   # BN reduction count = N*H*W

    x2 = x_ref[...]                # (R, WC) f32 -- doubles as the residual (identity)
    mup = mup_ref[...]             # (R, 1): 1.0 where h > 0   (top border mask)
    mdn = mdn_ref[...]             # (R, 1): 1.0 where h < H-1 (bottom border mask)
    pool = pool_ref[...]           # (WC, C): sums the W copies of each channel lane
    bcast = bcast_ref[...]         # (C, WC): broadcasts per-channel scalars back to lanes

    def conv3x3(inp, b_ref):
        """3x3 conv, stride 1, SAME pad, as 3 banded matmuls over the folded W*C axis."""
        # Neighbor rows in H via sublane roll; zero the per-image borders with the masks.
        up = pltpu.roll(inp, 1, axis=0) * mup        # row r-1 (zeroed where h == 0)
        dn = pltpu.roll(inp, R - 1, axis=0) * mdn    # row r+1 (zeroed where h == H-1)
        acc = jnp.dot(up.astype(compute_dtype), b_ref[0],
                      preferred_element_type=jnp.float32)
        acc = acc + jnp.dot(inp.astype(compute_dtype), b_ref[1],
                            preferred_element_type=jnp.float32)
        acc = acc + jnp.dot(dn.astype(compute_dtype), b_ref[2],
                            preferred_element_type=jnp.float32)
        return acc                                    # (R, WC) f32

    def batchnorm(acc, g_ref, b_ref):
        """Training-mode BN (biased var), stats in f32, one fused scale/shift pass."""
        s = jnp.sum(acc, axis=0, keepdims=True)                          # (1, WC)
        ss = jnp.sum(acc * acc, axis=0, keepdims=True)                   # (1, WC)
        sum_c = jnp.dot(s, pool, preferred_element_type=jnp.float32)     # (1, C)
        sumsq_c = jnp.dot(ss, pool, preferred_element_type=jnp.float32)  # (1, C)
        mean = sum_c * inv_cnt
        var = sumsq_c * inv_cnt - mean * mean
        scale_c = g_ref[...] * lax.rsqrt(var + EPS)                      # (1, C)
        shift_c = b_ref[...] - mean * scale_c                            # (1, C)
        scale = jnp.dot(scale_c, bcast, preferred_element_type=jnp.float32)  # (1, WC)
        shift = jnp.dot(shift_c, bcast, preferred_element_type=jnp.float32)  # (1, WC)
        return acc * scale + shift

    out1 = jnp.maximum(batchnorm(conv3x3(x2, b1_ref), g1_ref, be1_ref), 0.0)
    out2 = batchnorm(conv3x3(out1, b2_ref), g2_ref, be2_ref) + x2        # identity residual
    out_ref[...] = jnp.maximum(out2, 0.0)


def _conv3x3_band_weights(w_hwio, width):
    """Fold a (3,3,Cin,Cout) kernel into 3 banded (W*Cin, W*Cout) matrices.

    band[ky][wi*Cin+ci, wo*Cout+co] = w[ky, wi-wo+1, ci, co]  (zero outside the band),
    so conv(x)[n,h,wo,:] = sum_ky x_folded[n, h+ky-1, :] @ band[ky]; SAME padding along
    W is implied by the band structure (out-of-range taps simply have no entries).
    """
    kh, kw, cin, cout = w_hwio.shape
    bands = []
    for ky in range(kh):
        b = jnp.zeros((width * cin, width * cout), w_hwio.dtype)
        for kx in range(kw):
            b = b + jnp.kron(jnp.eye(width, k=1 - kx, dtype=w_hwio.dtype), w_hwio[ky, kx])
        bands.append(b)
    return jnp.stack(bands)          # (3, W*Cin, W*Cout)


def basic_block_forward_nhwc(x_nhwc, w1_hwio, w2_hwio, gamma1, beta1, gamma2, beta2,
                             *, compute_dtype=jnp.float32):
    """x_nhwc: (N, H, W, C) float32. Returns (N, H, W, C) float32."""
    N, H, W, C = x_nhwc.shape
    P = w1_hwio.shape[-1]
    assert C == P and w2_hwio.shape == (3, 3, P, P), \
        "identity residual requires inplanes == planes (stride=1, downsample=None)"
    R, WC = N * H, W * C

    x2 = x_nhwc.astype(jnp.float32).reshape(R, WC)       # contiguous reshape (no pad pass)

    band1 = _conv3x3_band_weights(w1_hwio.astype(jnp.float32), W).astype(compute_dtype)
    band2 = _conv3x3_band_weights(w2_hwio.astype(jnp.float32), W).astype(compute_dtype)

    eye_c = jnp.eye(C, dtype=jnp.float32)
    pool = jnp.kron(jnp.ones((W, 1), jnp.float32), eye_c)    # (WC, C)
    bcast = jnp.kron(jnp.ones((1, W), jnp.float32), eye_c)   # (C, WC)

    h_of_row = jnp.arange(R, dtype=jnp.int32) % H
    mask_up = (h_of_row > 0).astype(jnp.float32)[:, None]        # (R, 1)
    mask_dn = (h_of_row < H - 1).astype(jnp.float32)[:, None]    # (R, 1)

    vmem = pl.BlockSpec(memory_space=pltpu.MemorySpace.VMEM)
    kernel = functools.partial(_basic_block_kernel, compute_dtype=compute_dtype)

    out2 = pl.pallas_call(
        kernel,
        out_shape=jax.ShapeDtypeStruct((R, WC), jnp.float32),
        in_specs=[vmem] * 11,
        out_specs=vmem,
    )(x2, band1, band2, pool, bcast,
      gamma1.reshape(1, C).astype(jnp.float32), beta1.reshape(1, C).astype(jnp.float32),
      gamma2.reshape(1, C).astype(jnp.float32), beta2.reshape(1, C).astype(jnp.float32),
      mask_up, mask_dn)

    return out2.reshape(N, H, W, C)


def basic_block_forward(x_nchw, w1_hwio, w2_hwio, gamma1, beta1, gamma2, beta2,
                        *, compute_dtype=jnp.float32):
    """PyTorch-layout adapter: x_nchw (N, C, H, W) -> (N, C, H, W)."""
    x_nhwc = jnp.transpose(x_nchw, (0, 2, 3, 1))
    out = basic_block_forward_nhwc(x_nhwc, w1_hwio, w2_hwio,
                                   gamma1, beta1, gamma2, beta2,
                                   compute_dtype=compute_dtype)
    return jnp.transpose(out, (0, 3, 1, 2))


def reference_forward(x_nchw, w1_hwio, w2_hwio, gamma1, beta1, gamma2, beta2):
    """Pure-JAX reference (same math, lax.conv) for sanity checking."""
    def conv3x3(x, w_hwio):
        return lax.conv_general_dilated(
            x, w_hwio, window_strides=(1, 1), padding=((1, 1), (1, 1)),
            dimension_numbers=("NCHW", "HWIO", "NCHW"))

    def bn_train(x, gamma, beta):
        mean = jnp.mean(x, axis=(0, 2, 3), keepdims=True)
        var = jnp.mean((x - mean) ** 2, axis=(0, 2, 3), keepdims=True)
        return ((x - mean) * lax.rsqrt(var + EPS)
                * gamma.reshape(1, -1, 1, 1) + beta.reshape(1, -1, 1, 1))

    out = jnp.maximum(bn_train(conv3x3(x_nchw, w1_hwio), gamma1, beta1), 0.0)
    out = bn_train(conv3x3(out, w2_hwio), gamma2, beta2) + x_nchw
    return jnp.maximum(out, 0.0)


if __name__ == "__main__":
    key = jax.random.PRNGKey(0)
    k_x, k_w1, k_w2, k_g1, k_b1, k_g2, k_b2 = jax.random.split(key, 7)

    N, C, H, W = 2, 4, 16, 16        # inplanes = planes = 4, stride = 1, downsample = None
    P = C

    x = jax.random.normal(k_x, (N, C, H, W), dtype=jnp.float32)

    # Conv weights in HWIO layout: (3, 3, Cin, Cout), no bias (conv3x3 has bias=False).
    w1 = 0.1 * jax.random.normal(k_w1, (3, 3, C, P), dtype=jnp.float32)
    w2 = 0.1 * jax.random.normal(k_w2, (3, 3, P, P), dtype=jnp.float32)

    # BatchNorm affine params (perturbed from the PyTorch init to exercise the path).
    gamma1 = 1.0 + 0.1 * jax.random.normal(k_g1, (P,), dtype=jnp.float32)
    beta1 = 0.1 * jax.random.normal(k_b1, (P,), dtype=jnp.float32)
    gamma2 = 1.0 + 0.1 * jax.random.normal(k_g2, (P,), dtype=jnp.float32)
    beta2 = 0.1 * jax.random.normal(k_b2, (P,), dtype=jnp.float32)

    out = jax.jit(basic_block_forward)(x, w1, w2, gamma1, beta1, gamma2, beta2)
    out = jax.block_until_ready(out)

    ref = jax.block_until_ready(
        reference_forward(x, w1, w2, gamma1, beta1, gamma2, beta2))

    assert out.shape == (N, C, H, W)
    assert jnp.allclose(out, ref, atol=2e-4, rtol=2e-4), "mismatch vs reference"

    print("KERNEL_OK")
</pallas_src>

<mosaic_0001>
module attributes {stable_mosaic.version = 11 : i64} {
  func.func @_basic_block_kernel(%arg0: memref<32x64xf32, #tpu.memory_space<vmem>>, %arg1: memref<3x64x64xf32, #tpu.memory_space<vmem>>, %arg2: memref<3x64x64xf32, #tpu.memory_space<vmem>>, %arg3: memref<64x4xf32, #tpu.memory_space<vmem>>, %arg4: memref<4x64xf32, #tpu.memory_space<vmem>>, %arg5: memref<1x4xf32, #tpu.memory_space<vmem>>, %arg6: memref<1x4xf32, #tpu.memory_space<vmem>>, %arg7: memref<1x4xf32, #tpu.memory_space<vmem>>, %arg8: memref<1x4xf32, #tpu.memory_space<vmem>>, %arg9: memref<32x1xf32, #tpu.memory_space<vmem>>, %arg10: memref<32x1xf32, #tpu.memory_space<vmem>>, %arg11: memref<32x64xf32, #tpu.memory_space<vmem>>) attributes {dimension_semantics = [], scalar_prefetch = 0 : i64, scratch_operands = 0 : i64, tpu.core_type = #tpu.core_type<tc>} {
    %c0 = arith.constant 0 : index
    %c0_0 = arith.constant 0 : index
    %0 = vector.load %arg0[%c0, %c0_0] : memref<32x64xf32, #tpu.memory_space<vmem>>, vector<32x64xf32>
    %c0_1 = arith.constant 0 : index
    %c0_2 = arith.constant 0 : index
    %1 = vector.load %arg9[%c0_1, %c0_2] : memref<32x1xf32, #tpu.memory_space<vmem>>, vector<32x1xf32>
    %c0_3 = arith.constant 0 : index
    %c0_4 = arith.constant 0 : index
    %2 = vector.load %arg10[%c0_3, %c0_4] : memref<32x1xf32, #tpu.memory_space<vmem>>, vector<32x1xf32>
    %c0_5 = arith.constant 0 : index
    %c0_6 = arith.constant 0 : index
    %3 = vector.load %arg3[%c0_5, %c0_6] : memref<64x4xf32, #tpu.memory_space<vmem>>, vector<64x4xf32>
    %c0_7 = arith.constant 0 : index
    %c0_8 = arith.constant 0 : index
    %4 = vector.load %arg4[%c0_7, %c0_8] : memref<4x64xf32, #tpu.memory_space<vmem>>, vector<4x64xf32>
    %c1_i32 = arith.constant 1 : i32
    %5 = tpu.dynamic_rotate %0 by %c1_i32 dim 0 : vector<32x64xf32>, i32 -> vector<32x64xf32>
    %6 = vector.broadcast %1 : vector<32x1xf32> to vector<32x64xf32>
    %7 = arith.mulf %5, %6 : vector<32x64xf32>
    %c31_i32 = arith.constant 31 : i32
    %8 = tpu.dynamic_rotate %0 by %c31_i32 dim 0 : vector<32x64xf32>, i32 -> vector<32x64xf32>
    %9 = vector.broadcast %2 : vector<32x1xf32> to vector<32x64xf32>
    %10 = arith.mulf %8, %9 : vector<32x64xf32>
    %c0_9 = arith.constant 0 : index
    %c0_10 = arith.constant 0 : index
    %c0_11 = arith.constant 0 : index
    %11 = vector.load %arg1[%c0_9, %c0_10, %c0_11] : memref<3x64x64xf32, #tpu.memory_space<vmem>>, vector<1x64x64xf32>
    %12 = vector.shape_cast %11 : vector<1x64x64xf32> to vector<64x64xf32>
    %cst = arith.constant dense<0.000000e+00> : vector<32x64xf32>
    %13 = tpu.matmul %7, %12, %cst {dimension_numbers = #tpu.dot_dimension_numbers<[1], [0], [0], [1], [0, 0, 1, 1], [], []>} : vector<32x64xf32>, vector<64x64xf32>, vector<32x64xf32> -> vector<32x64xf32>
    %c1 = arith.constant 1 : index
    %c0_12 = arith.constant 0 : index
    %c0_13 = arith.constant 0 : index
    %14 = vector.load %arg1[%c1, %c0_12, %c0_13] : memref<3x64x64xf32, #tpu.memory_space<vmem>>, vector<1x64x64xf32>
    %15 = vector.shape_cast %14 : vector<1x64x64xf32> to vector<64x64xf32>
    %cst_14 = arith.constant dense<0.000000e+00> : vector<32x64xf32>
    %16 = tpu.matmul %0, %15, %cst_14 {dimension_numbers = #tpu.dot_dimension_numbers<[1], [0], [0], [1], [0, 0, 1, 1], [], []>} : vector<32x64xf32>, vector<64x64xf32>, vector<32x64xf32> -> vector<32x64xf32>
    %17 = arith.addf %13, %16 : vector<32x64xf32>
    %c2 = arith.constant 2 : index
    %c0_15 = arith.constant 0 : index
    %c0_16 = arith.constant 0 : index
    %18 = vector.load %arg1[%c2, %c0_15, %c0_16] : memref<3x64x64xf32, #tpu.memory_space<vmem>>, vector<1x64x64xf32>
    %19 = vector.shape_cast %18 : vector<1x64x64xf32> to vector<64x64xf32>
    %cst_17 = arith.constant dense<0.000000e+00> : vector<32x64xf32>
    %20 = tpu.matmul %10, %19, %cst_17 {dimension_numbers = #tpu.dot_dimension_numbers<[1], [0], [0], [1], [0, 0, 1, 1], [], []>} : vector<32x64xf32>, vector<64x64xf32>, vector<32x64xf32> -> vector<32x64xf32>
    %21 = arith.addf %17, %20 : vector<32x64xf32>
    %cst_18 = arith.constant dense<0.000000e+00> : vector<64xf32>
    %22 = vector.multi_reduction <add>, %21, %cst_18 [0] : vector<32x64xf32> to vector<64xf32>
    %23 = vector.shape_cast %22 : vector<64xf32> to vector<1x64xf32>
    %24 = arith.mulf %21, %21 : vector<32x64xf32>
    %cst_19 = arith.constant dense<0.000000e+00> : vector<64xf32>
    %25 = vector.multi_reduction <add>, %24, %cst_19 [0] : vector<32x64xf32> to vector<64xf32>
    %26 = vector.shape_cast %25 : vector<64xf32> to vector<1x64xf32>
    %cst_20 = arith.constant dense<0.000000e+00> : vector<1x4xf32>
    %27 = tpu.matmul %23, %3, %cst_20 {dimension_numbers = #tpu.dot_dimension_numbers<[1], [0], [0], [1], [0, 0, 1, 1], [], []>} : vector<1x64xf32>, vector<64x4xf32>, vector<1x4xf32> -> vector<1x4xf32>
    %cst_21 = arith.constant dense<0.000000e+00> : vector<1x4xf32>
    %28 = tpu.matmul %26, %3, %cst_21 {dimension_numbers = #tpu.dot_dimension_numbers<[1], [0], [0], [1], [0, 0, 1, 1], [], []>} : vector<1x64xf32>, vector<64x4xf32>, vector<1x4xf32> -> vector<1x4xf32>
    %cst_22 = arith.constant 0.001953125 : f32
    %29 = vector.broadcast %cst_22 : f32 to vector<1x4xf32>
    %30 = arith.mulf %27, %29 : vector<1x4xf32>
    %cst_23 = arith.constant 0.001953125 : f32
    %31 = vector.broadcast %cst_23 : f32 to vector<1x4xf32>
    %32 = arith.mulf %28, %31 : vector<1x4xf32>
    %33 = arith.mulf %30, %30 : vector<1x4xf32>
    %34 = arith.subf %32, %33 : vector<1x4xf32>
    %c0_24 = arith.constant 0 : index
    %c0_25 = arith.constant 0 : index
    %35 = vector.load %arg5[%c0_24, %c0_25] : memref<1x4xf32, #tpu.memory_space<vmem>>, vector<1x4xf32>
    %cst_26 = arith.constant 9.99999974E-6 : f32
    %36 = vector.broadcast %cst_26 : f32 to vector<1x4xf32>
    %37 = arith.addf %34, %36 : vector<1x4xf32>
    %38 = math.rsqrt %37 : vector<1x4xf32>
    %39 = arith.mulf %35, %38 : vector<1x4xf32>
    %c0_27 = arith.constant 0 : index
    %c0_28 = arith.constant 0 : index
    %40 = vector.load %arg6[%c0_27, %c0_28] : memref<1x4xf32, #tpu.memory_space<vmem>>, vector<1x4xf32>
    %41 = arith.mulf %30, %39 : vector<1x4xf32>
    %42 = arith.subf %40, %41 : vector<1x4xf32>
    %cst_29 = arith.constant dense<0.000000e+00> : vector<1x64xf32>
    %43 = tpu.matmul %39, %4, %cst_29 {dimension_numbers = #tpu.dot_dimension_numbers<[1], [0], [0], [1], [0, 0, 1, 1], [], []>} : vector<1x4xf32>, vector<4x64xf32>, vector<1x64xf32> -> vector<1x64xf32>
    %cst_30 = arith.constant dense<0.000000e+00> : vector<1x64xf32>
    %44 = tpu.matmul %42, %4, %cst_30 {dimension_numbers = #tpu.dot_dimension_numbers<[1], [0], [0], [1], [0, 0, 1, 1], [], []>} : vector<1x4xf32>, vector<4x64xf32>, vector<1x64xf32> -> vector<1x64xf32>
    %45 = vector.broadcast %43 : vector<1x64xf32> to vector<32x64xf32>
    %46 = arith.mulf %21, %45 : vector<32x64xf32>
    %47 = vector.broadcast %44 : vector<1x64xf32> to vector<32x64xf32>
    %48 = arith.addf %46, %47 : vector<32x64xf32>
    %cst_31 = arith.constant 0.000000e+00 : f32
    %49 = vector.broadcast %cst_31 : f32 to vector<32x64xf32>
    %50 = arith.maximumf %48, %49 : vector<32x64xf32>
    %c1_i32_32 = arith.constant 1 : i32
    %51 = tpu.dynamic_rotate %50 by %c1_i32_32 dim 0 : vector<32x64xf32>, i32 -> vector<32x64xf32>
    %52 = vector.broadcast %1 : vector<32x1xf32> to vector<32x64xf32>
    %53 = arith.mulf %51, %52 : vector<32x64xf32>
    %c31_i32_33 = arith.constant 31 : i32
    %54 = tpu.dynamic_rotate %50 by %c31_i32_33 dim 0 : vector<32x64xf32>, i32 -> vector<32x64xf32>
    %55 = vector.broadcast %2 : vector<32x1xf32> to vector<32x64xf32>
    %56 = arith.mulf %54, %55 : vector<32x64xf32>
    %c0_34 = arith.constant 0 : index
    %c0_35 = arith.constant 0 : index
    %c0_36 = arith.constant 0 : index
    %57 = vector.load %arg2[%c0_34, %c0_35, %c0_36] : memref<3x64x64xf32, #tpu.memory_space<vmem>>, vector<1x64x64xf32>
    %58 = vector.shape_cast %57 : vector<1x64x64xf32> to vector<64x64xf32>
    %cst_37 = arith.constant dense<0.000000e+00> : vector<32x64xf32>
    %59 = tpu.matmul %53, %58, %cst_37 {dimension_numbers = #tpu.dot_dimension_numbers<[1], [0], [0], [1], [0, 0, 1, 1], [], []>} : vector<32x64xf32>, vector<64x64xf32>, vector<32x64xf32> -> vector<32x64xf32>
    %c1_38 = arith.constant 1 : index
    %c0_39 = arith.constant 0 : index
    %c0_40 = arith.constant 0 : index
    %60 = vector.load %arg2[%c1_38, %c0_39, %c0_40] : memref<3x64x64xf32, #tpu.memory_space<vmem>>, vector<1x64x64xf32>
    %61 = vector.shape_cast %60 : vector<1x64x64xf32> to vector<64x64xf32>
    %cst_41 = arith.constant dense<0.000000e+00> : vector<32x64xf32>
    %62 = tpu.matmul %50, %61, %cst_41 {dimension_numbers = #tpu.dot_dimension_numbers<[1], [0], [0], [1], [0, 0, 1, 1], [], []>} : vector<32x64xf32>, vector<64x64xf32>, vector<32x64xf32> -> vector<32x64xf32>
    %63 = arith.addf %59, %62 : vector<32x64xf32>
    %c2_42 = arith.constant 2 : index
    %c0_43 = arith.constant 0 : index
    %c0_44 = arith.constant 0 : index
    %64 = vector.load %arg2[%c2_42, %c0_43, %c0_44] : memref<3x64x64xf32, #tpu.memory_space<vmem>>, vector<1x64x64xf32>
    %65 = vector.shape_cast %64 : vector<1x64x64xf32> to vector<64x64xf32>
    %cst_45 = arith.constant dense<0.000000e+00> : vector<32x64xf32>
    %66 = tpu.matmul %56, %65, %cst_45 {dimension_numbers = #tpu.dot_dimension_numbers<[1], [0], [0], [1], [0, 0, 1, 1], [], []>} : vector<32x64xf32>, vector<64x64xf32>, vector<32x64xf32> -> vector<32x64xf32>
    %67 = arith.addf %63, %66 : vector<32x64xf32>
    %cst_46 = arith.constant dense<0.000000e+00> : vector<64xf32>
    %68 = vector.multi_reduction <add>, %67, %cst_46 [0] : vector<32x64xf32> to vector<64xf32>
    %69 = vector.shape_cast %68 : vector<64xf32> to vector<1x64xf32>
    %70 = arith.mulf %67, %67 : vector<32x64xf32>
    %cst_47 = arith.constant dense<0.000000e+00> : vector<64xf32>
    %71 = vector.multi_reduction <add>, %70, %cst_47 [0] : vector<32x64xf32> to vector<64xf32>
    %72 = vector.shape_cast %71 : vector<64xf32> to vector<1x64xf32>
    %cst_48 = arith.constant dense<0.000000e+00> : vector<1x4xf32>
    %73 = tpu.matmul %69, %3, %cst_48 {dimension_numbers = #tpu.dot_dimension_numbers<[1], [0], [0], [1], [0, 0, 1, 1], [], []>} : vector<1x64xf32>, vector<64x4xf32>, vector<1x4xf32> -> vector<1x4xf32>
    %cst_49 = arith.constant dense<0.000000e+00> : vector<1x4xf32>
    %74 = tpu.matmul %72, %3, %cst_49 {dimension_numbers = #tpu.dot_dimension_numbers<[1], [0], [0], [1], [0, 0, 1, 1], [], []>} : vector<1x64xf32>, vector<64x4xf32>, vector<1x4xf32> -> vector<1x4xf32>
    %cst_50 = arith.constant 0.001953125 : f32
    %75 = vector.broadcast %cst_50 : f32 to vector<1x4xf32>
    %76 = arith.mulf %73, %75 : vector<1x4xf32>
    %cst_51 = arith.constant 0.001953125 : f32
    %77 = vector.broadcast %cst_51 : f32 to vector<1x4xf32>
    %78 = arith.mulf %74, %77 : vector<1x4xf32>
    %79 = arith.mulf %76, %76 : vector<1x4xf32>
    %80 = arith.subf %78, %79 : vector<1x4xf32>
    %c0_52 = arith.constant 0 : index
    %c0_53 = arith.constant 0 : index
    %81 = vector.load %arg7[%c0_52, %c0_53] : memref<1x4xf32, #tpu.memory_space<vmem>>, vector<1x4xf32>
    %cst_54 = arith.constant 9.99999974E-6 : f32
    %82 = vector.broadcast %cst_54 : f32 to vector<1x4xf32>
    %83 = arith.addf %80, %82 : vector<1x4xf32>
    %84 = math.rsqrt %83 : vector<1x4xf32>
    %85 = arith.mulf %81, %84 : vector<1x4xf32>
    %c0_55 = arith.constant 0 : index
    %c0_56 = arith.constant 0 : index
    %86 = vector.load %arg8[%c0_55, %c0_56] : memref<1x4xf32, #tpu.memory_space<vmem>>, vector<1x4xf32>
    %87 = arith.mulf %76, %85 : vector<1x4xf32>
    %88 = arith.subf %86, %87 : vector<1x4xf32>
    %cst_57 = arith.constant dense<0.000000e+00> : vector<1x64xf32>
    %89 = tpu.matmul %85, %4, %cst_57 {dimension_numbers = #tpu.dot_dimension_numbers<[1], [0], [0], [1], [0, 0, 1, 1], [], []>} : vector<1x4xf32>, vector<4x64xf32>, vector<1x64xf32> -> vector<1x64xf32>
    %cst_58 = arith.constant dense<0.000000e+00> : vector<1x64xf32>
    %90 = tpu.matmul %88, %4, %cst_58 {dimension_numbers = #tpu.dot_dimension_numbers<[1], [0], [0], [1], [0, 0, 1, 1], [], []>} : vector<1x4xf32>, vector<4x64xf32>, vector<1x64xf32> -> vector<1x64xf32>
    %91 = vector.broadcast %89 : vector<1x64xf32> to vector<32x64xf32>
    %92 = arith.mulf %67, %91 : vector<32x64xf32>
    %93 = vector.broadcast %90 : vector<1x64xf32> to vector<32x64xf32>
    %94 = arith.addf %92, %93 : vector<32x64xf32>
    %95 = arith.addf %94, %0 : vector<32x64xf32>
    %cst_59 = arith.constant 0.000000e+00 : f32
    %96 = vector.broadcast %cst_59 : f32 to vector<32x64xf32>
    %97 = arith.maximumf %95, %96 : vector<32x64xf32>
    %c0_60 = arith.constant 0 : index
    %c0_61 = arith.constant 0 : index
    %98 = vector.load %arg11[%c0_60, %c0_61] : memref<32x64xf32, #tpu.memory_space<vmem>>, vector<32x64xf32>
    tpu.vector_store %arg11[%c0_60, %c0_61], %97 {strides = array<i32>} : memref<32x64xf32, #tpu.memory_space<vmem>>, vector<32x64xf32>,
    return
  }
}

</mosaic_0001>

<bundles_post_ra>
// kernel: basic_block_forward.1
= control target key start
LH: loop header
LB: loop body
LE: loop exit
PB: predicated region body
PF: predicated region fallthrough
CT: control target
= control target key end

     0   :  { %v2099_v0 = vmov 0   ;;  %vm144_vm0 = vcmask 523264   ;;  %v63_v40 = vlaneseq  ;;  %vm2101_vm3 = vmmov 0   ;;  %s2663_s9 = inlined_call_operand.vmem [shape: f32[32,1], index: 9, kind: input, shape index: {}]   ;;  %s2664_s1 = inlined_call_operand.vmem [shape: f32[3,64,64], index: 1, kind: input, shape index: {}]   ;;  %s2665_s0 = inlined_call_operand.vmem [shape: f32[32,64], index: 0, kind: input, shape index: {}]   ;;  %s2666_s10 = inlined_call_operand.vmem [shape: f32[32,1], index: 10, kind: input, shape index: {}]   ;;  %s2667_s3 = inlined_call_operand.vmem [shape: f32[64,4], index: 3, kind: input, shape index: {}]   ;;  %s2668_s4 = inlined_call_operand.vmem [shape: f32[4,64], index: 4, kind: input, shape index: {}]   ;;  %s2669_s5 = inlined_call_operand.vmem [shape: f32[1,4], index: 5, kind: input, shape index: {}]   ;;  %s2670_s2 = inlined_call_operand.vmem [shape: f32[3,64,64], index: 2, kind: input, shape index: {}]   ;;  %s2671_s6 = inlined_call_operand.vmem [shape: f32[1,4], index: 6, kind: input, shape index: {}]   ;;  %s2672_s7 = inlined_call_operand.vmem [shape: f32[1,4], index: 7, kind: input, shape index: {}]   ;;  %s2673_s8 = inlined_call_operand.vmem [shape: f32[1,4], index: 8, kind: input, shape index: {}]   ;;  %s2674_s11 = inlined_call_operand.vmem [shape: f32[32,64], index: 11, kind: output, shape index: {}]  }
   0x1   :  { %2094 = vset.pattern.permute.xlu1 %v2099_v0  ;;  %2093 = vset.pattern.permute.xlu0 %v2099_v0  ;;  %v44_v1 = vld [vmem:[%s2663_s9 + $0x10] sm:$0xff]  ;;  %v42_v2 = vld [vmem:[%s2663_s9] sm:$0xff]  ;;  %v45_v3 = vld [vmem:[%s2663_s9 + $0x18] sm:$0xff]  ;;  %vm640_vm4 = vcmask 1043456   ;;  %vm636_vm5 = vcmask 31744  }
   0x2   :  { %82 = vperm.xlu1 %2094, %v44_v1   ;;  %72 = vperm.xlu0 %2093, %v42_v2   ;;  %v43_v4 = vld [vmem:[%s2663_s9 + $0x8] sm:$0xff]  ;;  %v1517_v5 = vld [vmem:[%s2664_s1 + $0x40] sm:$0xff]  ;;  %v1519_v7 = vld [vmem:[%s2664_s1 + $0x50] sm:$0xff]  ;;  %v2269_v41 = vshrl.u32 %v63_v40, 7 }
   0x3   :  { %v1518_v6 = vld [vmem:[%s2664_s1 + $0x48] sm:$0xff]  ;;  %v1520_v8 = vld [vmem:[%s2664_s1 + $0x58] sm:$0xff]  ;;  %v1521_v11 = vld [vmem:[%s2664_s1 + $0x60] sm:$0xff] }
   0x4   :  { %v1929_v9 = vpack.c.bf16 %v1518_v6, %v1517_v5  ;;  %v1933_v10 = vpack.c.bf16 %v1520_v8, %v1519_v7  ;;  %v1522_v12 = vld [vmem:[%s2664_s1 + $0x68] sm:$0xff]  ;;  %v2196_v13 = vld [vmem:[%s2665_s0] sm:$0xff]  ;;  %v1523_v17 = vld [vmem:[%s2664_s1 + $0x70] sm:$0xff]  ;;  %vm65_vm1 = vcmp.lt.s32.totalorder %v2269_v41, 1  ;;  %vm98_vm2 = vcmp.lt.s32.totalorder %v2269_v41, 7 }
   0x5   :  { %v47_v14 = vld [vmem:[%s2666_s10 + $0x8] sm:$0xff]  ;;  %v46_v15 = vld [vmem:[%s2666_s10] sm:$0xff]  ;;  %1717 = vmatprep.mubr.msk.f32.mxu0 %vm144_vm0, %v2196_v13  ;;  %v1937_v16 = vpack.c.bf16 %v1522_v12, %v1521_v11  ;;  %v1524_v18 = vld [vmem:[%s2664_s1 + $0x78] sm:$0xff]  ;;  %v59_v42 = vrot.slane %v2196_v13, 7  ;;  %v94_v53 = vrot.slane %v2196_v13, 1 }
   0x6   :  { %87 = vperm.xlu1 %2094, %v45_v3   ;;  %77 = vperm.xlu0 %2093, %v43_v4   ;;  %v49_v19 = vld [vmem:[%s2666_s10 + $0x18] sm:$0xff]  ;;  %v48_v20 = vld [vmem:[%s2666_s10 + $0x10] sm:$0xff]  ;;  %v1941_v21 = vpack.c.bf16 %v1524_v18, %v1523_v17  ;;  %v127_v22 = vld [vmem:[%s2664_s1] sm:$0xff] }
   0x7   :  { %1930 = vmatprep.subr.bf16.mxu0 %v1929_v9  ;;  %v128_v23 = vld [vmem:[%s2664_s1 + $0x8] sm:$0xff]  ;;  %v129_v25 = vld [vmem:[%s2664_s1 + $0x10] sm:$0xff]  ;;  %v130_v26 = vld [vmem:[%s2664_s1 + $0x18] sm:$0xff] }
   0x8   :  { %1932 = vmatpush3.bf16.msra.mxu0 %v1929_v9  ;;  %v1945_v24 = vpack.c.bf16 %v128_v23, %v127_v22  ;;  %v2233_v27 = vld [vmem:[%s2665_s0 + $0x8] sm:$0xff]  ;;  %v1949_v28 = vpack.c.bf16 %v130_v26, %v129_v25  ;;  %v2238_v29 = vld [vmem:[%s2665_s0 + $0x10] sm:$0xff]  ;;  %v131_v30 = vld [vmem:[%s2664_s1 + $0x20] sm:$0xff]  ;;  %v2100_v23 = vmov 0.0|0.0  }
   0x9   :  { %1934 = vmatprep.subr.bf16.mxu0 %v1933_v10  ;;  %v132_v31 = vld [vmem:[%s2664_s1 + $0x28] sm:$0xff]  ;;  %v2253_v33 = vld [vmem:[%s2665_s0 + $0x18] sm:$0xff]  ;;  %v133_v34 = vld [vmem:[%s2664_s1 + $0x30] sm:$0xff]  ;;  %v61_v44 = vrot.slane %v2238_v29, 7  ;;  %v60_v45 = vrot.slane %v2233_v27, 7  ;;  %v95_v52 = vrot.slane %v2233_v27, 1  ;;  %1977 = vmatprep.subr.bf16.mxu1 %v2100_v23 }
   0xa   :  { %110 = vperm.xlu1 %2094, %v47_v14   ;;  %105 = vperm.xlu0 %2093, %v46_v15   ;;  %v1953_v32 = vpack.c.bf16 %v132_v31, %v131_v30  ;;  %v134_v35 = vld [vmem:[%s2664_s1 + $0x38] sm:$0xff]  ;;  %v1533_v37 = vld [vmem:[%s2664_s1 + $0x80] sm:$0xff]  ;;  %v1534_v38 = vld [vmem:[%s2664_s1 + $0x88] sm:$0xff]  ;;  %v62_v43 = vrot.slane %v2253_v33, 7  ;;  %v96_v8 = vrot.slane %v2238_v29, 1  ;;  %v97_v9 = vrot.slane %v2253_v33, 1 }
   0xb   :  { %v1957_v36 = vpack.c.bf16 %v134_v35, %v133_v34  ;;  %v1961_v39 = vpack.c.bf16 %v1534_v38, %v1533_v37  ;;  %v67_v49 = vsel %vm65_vm1, %v60_v45, %v61_v44  ;;  %v68_v51 = vsel %vm65_vm1, %v59_v42, %v60_v45  ;;  %v1535_v54 = vld [vmem:[%s2664_s1 + $0x90] sm:$0xff]  ;;  %v1536_v55 = vld [vmem:[%s2664_s1 + $0x98] sm:$0xff]  ;;  %v1537_v63 = vld [vmem:[%s2664_s1 + $0xa0] sm:$0xff] }
   0xc   :  { %1936 = vmatpush3.bf16.msra.mxu0 %v1933_v10  ;;  %v69_v46 = vsel %vm65_vm1, %v62_v43, %v59_v42  ;;  %v66_v57 = vsel %vm65_vm1, %v61_v44, %v62_v43  ;;  %v1965_v60 = vpack.c.bf16 %v1536_v55, %v1535_v54  ;;  %v101_v62 = vsel %vm98_vm2, %v94_v53, %v95_v52  ;;  %v1538_v0 = vld [vmem:[%s2664_s1 + $0xa8] sm:$0xff]  ;;  %v1539_v5 = vld [vmem:[%s2664_s1 + $0xb0] sm:$0xff]  ;;  %v1540_v6 = vld [vmem:[%s2664_s1 + $0xb8] sm:$0xff] }
   0xd   :  { %1938 = vmatprep.subr.bf16.mxu0 %v1937_v16  ;;  %v1969_v4 = vpack.c.bf16 %v1538_v0, %v1537_v63  ;;  %v1973_v7 = vpack.c.bf16 %v1540_v6, %v1539_v5  ;;  %v100_v11 = vsel %vm98_vm2, %v95_v52, %v96_v8  ;;  %v99_v14 = vsel %vm98_vm2, %v96_v8, %v97_v9  ;;  %v53_v25 = vld [vmem:[%s2667_s3 + $0x18] sm:$0xff]  ;;  %v55_v30 = vld [vmem:[%s2667_s3 + $0x28] sm:$0xff] }
   0xe   :  { %120 = vperm.xlu1 %2094, %v49_v19   ;;  %115 = vperm.xlu0 %2093, %v48_v20   ;;  %v102_v17 = vsel %vm98_vm2, %v97_v9, %v94_v53  ;;  %v50_v20 = vld [vmem:[%s2667_s3] sm:$0xff]  ;;  %v57_v34 = vld [vmem:[%s2667_s3 + $0x38] sm:$0xff] }
  0x10   :  { %1940 = vmatpush3.bf16.msra.mxu0 %v1937_v16 }
  0x11   :  { %1942 = vmatprep.subr.bf16.mxu0 %v1941_v21 }
  0x14   :  { %1944 = vmatpush3.bf16.msra.mxu0 %v1941_v21  ;;  %v51_v21 = vld [vmem:[%s2667_s3 + $0x8] sm:$0xff] }
  0x15   :  { %1946 = vmatprep.subr.bf16.mxu0 %v1945_v24  ;;  %v2353_v22 = vpack.c.bf16 %v51_v21, %v50_v20 }
  0x17   :  { %1718 = vmatmul.mubr.msk.f32.vlgmr.msra.gmra.mrb[0].mxu0 %vm144_vm0, %v2233_v27  ;;  %1979 = vmatpush3.bf16.msra.mxu1 %v2353_v22 }
  0x18   :  { %1948 = vmatpush3.bf16.msra.mxu0 %v1945_v24  ;;  %1720 = vmatprep.mubr.msk.f32.mxu0 %vm144_vm0, %v2238_v29  ;;  %v52_v24 = vld [vmem:[%s2667_s3 + $0x10] sm:$0xff] }
  0x19   :  { %1950 = vmatprep.subr.bf16.mxu0 %v1949_v28  ;;  %1980 = vmatprep.subr.bf16.mxu1 %v2100_v23  ;;  %v2367_v26 = vpack.c.bf16 %v53_v25, %v52_v24 }
  0x1b   :  { %1721 = vmatmul.mubr.msk.f32.gmra.mrb[2].mxu0 %vm144_vm0, %v2253_v33  ;;  %1982 = vmatpush3.bf16.msra.mxu1 %v2367_v26 }
  0x1c   :  { %1952 = vmatpush3.bf16.msra.mxu0 %v1949_v28  ;;  %1983 = vmatprep.subr.bf16.mxu1 %v2100_v23  ;;  %v54_v28 = vld [vmem:[%s2667_s3 + $0x20] sm:$0xff] }
  0x1d   :  { %1954 = vmatprep.subr.bf16.mxu0 %v1953_v32  ;;  %v2379_v31 = vpack.c.bf16 %v55_v30, %v54_v28 }
  0x1f   :  { %1985 = vmatpush3.bf16.msra.mxu1 %v2379_v31 }
  0x20   :  { %1956 = vmatpush3.bf16.msra.mxu0 %v1953_v32  ;;  %1986 = vmatprep.subr.bf16.mxu1 %v2100_v23  ;;  %v56_v32 = vld [vmem:[%s2667_s3 + $0x30] sm:$0xff] }
  0x21   :  { %1958 = vmatprep.subr.bf16.mxu0 %v1957_v36  ;;  %v2391_v35 = vpack.c.bf16 %v57_v34, %v56_v32  ;;  %v629_v34 = vld [vmem:[%s2669_s5] sm:$0x1] }
  0x23   :  { %1988 = vmatpush3.bf16.msra.mxu1 %v2391_v35 }
  0x24   :  { %1960 = vmatpush3.bf16.msra.mxu0 %v1957_v36  ;;  %v2102_v36 = vmov 0.0   ;;  %1989 = vmatprep.subr.bf16.mxu1 %v2100_v23 }
  0x25   :  { %1962 = vmatprep.subr.bf16.mxu0 %v1961_v39  ;;  %1783 = vmatprep.mubr.msk.f32.mxu1 %vm2101_vm3, %v2102_v36 }
  0x81   :  { %v2278_v47 = vpop.permute.xlu1 %82  ;;  %v2280_v48 = vpop.permute.xlu0 %72 }
  0x82   :  { %v90_v50 = vmul.f32 %v2280_v48, %v69_v46  ;;  %v92_v56 = vmul.f32 %v2278_v47, %v67_v49 }
  0x84   :  { %1739 = vmatprep.mubr.msk.f32.mxu0 %vm144_vm0, %v90_v50 }
  0x85   :  { %v2300_v58 = vpop.permute.xlu0 %77  ;;  %v2303_v61 = vpop.permute.xlu1 %87 }
  0x86   :  { %v91_v59 = vmul.f32 %v2300_v58, %v68_v51  ;;  %v93_v1 = vmul.f32 %v2303_v61, %v66_v57 }
  0x88   :  { %1740 = vmatmul.mubr.msk.f32.vlgmr.msra.gmra.mrb[0].mxu0 %vm144_vm0, %v91_v59 }
  0x89   :  { %1964 = vmatpush3.bf16.msra.mxu0 %v1961_v39  ;;  %v2315_v2 = vpop.permute.xlu0 %105  ;;  %1742 = vmatprep.mubr.msk.f32.mxu0 %vm144_vm0, %v92_v56  ;;  %v2329_v10 = vpop.permute.xlu1 %110 }
  0x8a   :  { %v123_v3 = vmul.f32 %v2315_v2, %v101_v62  ;;  %1966 = vmatprep.subr.bf16.mxu0 %v1965_v60  ;;  %v124_v15 = vmul.f32 %v2329_v10, %v100_v11 }
  0x8c   :  { %1743 = vmatmul.mubr.msk.f32.gmra.mrb[2].mxu0 %vm144_vm0, %v93_v1 }
  0x8d   :  { %1968 = vmatpush3.bf16.msra.mxu0 %v1965_v60  ;;  %1761 = vmatprep.mubr.msk.f32.mxu0 %vm144_vm0, %v123_v3  ;;  %v2333_v12 = vpop.permute.xlu0 %115  ;;  %v2338_v16 = vpop.permute.xlu1 %120 }
  0x8e   :  { %1970 = vmatprep.subr.bf16.mxu0 %v1969_v4  ;;  %v125_v18 = vmul.f32 %v2333_v12, %v99_v14  ;;  %v126_v19 = vmul.f32 %v2338_v16, %v102_v17  ;;  %v2446_v17 = vld [vmem:[%s2668_s4] sm:$0xf] }
  0x91   :  { %1972 = vmatpush3.bf16.msra.mxu0 %v1969_v4 }
  0x92   :  { %1974 = vmatprep.subr.bf16.mxu0 %v1973_v7 }
  0x95   :  { %1976 = vmatpush3.bf16.msra.mxu0 %v1973_v7 }
  0x96   :  { %2049 = vmatprep.subr.bf16.mxu0 %v2100_v23 }
  0x98   :  { %1762 = vmatmul.mubr.msk.f32.vlgmr.msra.gmra.mrb[0].mxu0 %vm144_vm0, %v124_v15 }
  0x99   :  { %1764 = vmatprep.mubr.msk.f32.mxu0 %vm144_vm0, %v125_v18  ;;  %2051 = vmatpush3.bf16.msra.mxu0 %v2353_v22 }
  0x9a   :  { %2052 = vmatprep.subr.bf16.mxu0 %v2100_v23 }
  0x9c   :  { %1765 = vmatmul.mubr.msk.f32.gmra.mrb[2].mxu0 %vm144_vm0, %v126_v19 }
  0x9d   :  { %2054 = vmatpush3.bf16.msra.mxu0 %v2367_v26  ;;  %1897 = vmatprep.mubr.msk.f32.mxu0 %vm2101_vm3, %v2102_v36 }
  0x9e   :  { %2055 = vmatprep.subr.bf16.mxu0 %v2100_v23 }
  0xa1   :  { %2057 = vmatpush3.bf16.msra.mxu0 %v2379_v31 }
  0xa2   :  { %2058 = vmatprep.subr.bf16.mxu0 %v2100_v23 }
  0xa5   :  { %2060 = vmatpush3.bf16.msra.mxu0 %v2391_v35 }
  0xa6   :  { %2061 = vmatprep.subr.bf16.mxu0 %v2100_v23 }
 0x16b   :  { %v2401_v37 = vpop.f32.mrb[0].mxu0 }
 0x16c   :  { %v450_v38 = vsel %vm144_vm0, %v2401_v37, 0.0  ;;  %v463_v39 = vmul.f32 %v2401_v37, %v2401_v37  ;;  %v2407_v40 = vpop.f32.mrb[1].mxu0 }
 0x16d   :  { %v449_v42 = vsel %vm144_vm0, %v2407_v40, 0.0  ;;  %v462_v43 = vmul.f32 %v2407_v40, %v2407_v40 }
 0x16e   :  { %v467_v44 = vsel %vm144_vm0, %v463_v39, 0.0  ;;  %v451_v45 = vadd.f32 %v450_v38, %v449_v42  ;;  %v1551_v38 = vld [vmem:[%s2670_s2 + $0x40] sm:$0xff]  ;;  %v1552_v39 = vld [vmem:[%s2670_s2 + $0x48] sm:$0xff] }
 0x16f   :  { %v466_v46 = vsel %vm144_vm0, %v462_v43, 0.0  ;;  %v2415_v49 = vpop.f32.mrb[2].mxu0 }
 0x170   :  { %v468_v50 = vadd.f32 %v467_v44, %v466_v46  ;;  %v2417_v51 = vpop.f32.mrb[3].mxu0  ;;  %v465_v52 = vmul.f32 %v2415_v49, %v2415_v49  ;;  %v454_v56 = vsel %vm144_vm0, %v2415_v49, 0.0  ;;  %v2001_v44 = vpack.c.bf16 %v1552_v39, %v1551_v38  ;;  %v1553_v46 = vld [vmem:[%s2670_s2 + $0x50] sm:$0xff] }
 0x171   :  { %v452_v53 = vsel %vm144_vm0, %v2417_v51, 0.0  ;;  %v464_v54 = vmul.f32 %v2417_v51, %v2417_v51 }
 0x172   :  { %v453_v55 = vadd.f32 %v452_v53, %v451_v45  ;;  %v471_v62 = vsel %vm144_vm0, %v465_v52, 0.0  ;;  %v633_v45 = vld [vmem:[%s2671_s6] sm:$0x1] }
 0x173   :  { %v469_v57 = vsel %vm144_vm0, %v464_v54, 0.0 }
 0x174   :  { %v455_v59 = vadd.f32 %v454_v56, %v453_v55  ;;  %v470_v60 = vadd.f32 %v469_v57, %v468_v50  ;;  %v1554_v50 = vld [vmem:[%s2670_s2 + $0x58] sm:$0xff]  ;;  %v1555_v55 = vld [vmem:[%s2670_s2 + $0x60] sm:$0xff]  ;;  %v1556_v56 = vld [vmem:[%s2670_s2 + $0x68] sm:$0xff] }
 0x175   :  { %v2005_v54 = vpack.c.bf16 %v1554_v50, %v1553_v46  ;;  %v2009_v57 = vpack.c.bf16 %v1556_v56, %v1555_v55 }
 0x176   :  { %v456_v63 = vrot.slane %v455_v59, 4  ;;  %v472_v0 = vadd.f32 %v471_v62, %v470_v60  ;;  %v1558_v60 = vld [vmem:[%s2670_s2 + $0x78] sm:$0xff] }
 0x178   :  { %v457_v1 = vadd.f32 %v456_v63, %v455_v59  ;;  %v473_v4 = vrot.slane %v472_v0, 4  ;;  %v1557_v59 = vld [vmem:[%s2670_s2 + $0x70] sm:$0xff]  ;;  %v831_v63 = vld [vmem:[%s2670_s2] sm:$0xff] }
 0x179   :  { %v2013_v62 = vpack.c.bf16 %v1558_v60, %v1557_v59  ;;  %v837_v59 = vld [vmem:[%s2670_s2 + $0x30] sm:$0xff]  ;;  %v838_v60 = vld [vmem:[%s2670_s2 + $0x38] sm:$0xff] }
 0x17a   :  { %v458_v3 = vrot.slane %v457_v1, 2  ;;  %v474_v7 = vadd.f32 %v473_v4, %v472_v0  ;;  %v832_v0 = vld [vmem:[%s2670_s2 + $0x8] sm:$0xff] }
 0x17c   :  { %v459_v5 = vadd.f32 %v458_v3, %v457_v1  ;;  %v475_v9 = vrot.slane %v474_v7, 2  ;;  %v2017_v1 = vpack.c.bf16 %v832_v0, %v831_v63  ;;  %v2494_v3 = vsub.s32 0, %v2269_v41  ;;  %v1569_v41 = vld [vmem:[%s2670_s2 + $0x90] sm:$0xff] }
 0x17e   :  { %v460_v6 = vrot.slane %v459_v5, 1  ;;  %v476_v11 = vadd.f32 %v475_v9, %v474_v7 }
 0x180   :  { %v461_v8 = vadd.f32 %v460_v6, %v459_v5  ;;  %v477_v14 = vrot.slane %v476_v11, 1 }
 0x182   :  { %1784 = vmatmul.mubr.msk.f32.vlgmr.msra.gmra.mrb[0].mxu1 %vm144_vm0, %v461_v8  ;;  %v478_v15 = vadd.f32 %v477_v14, %v476_v11 }
 0x183   :  { %1991 = vmatpush3.bf16.msra.mxu1 %v2353_v22  ;;  %1802 = vmatprep.mubr.msk.f32.mxu1 %vm2101_vm3, %v2102_v36 }
 0x184   :  { %1992 = vmatprep.subr.bf16.mxu1 %v2100_v23 }
 0x187   :  { %1994 = vmatpush3.bf16.msra.mxu1 %v2367_v26 }
 0x188   :  { %1995 = vmatprep.subr.bf16.mxu1 %v2100_v23 }
 0x18b   :  { %1997 = vmatpush3.bf16.msra.mxu1 %v2379_v31 }
 0x18c   :  { %1998 = vmatprep.subr.bf16.mxu1 %v2100_v23 }
 0x18f   :  { %2000 = vmatpush3.bf16.msra.mxu1 %v2391_v35 }
 0x190   :  { %1805 = vmatprep.subr.mxu1 %v2102_v36 }
 0x192   :  { %1803 = vmatmul.mubr.msk.f32.vlgmr.msra.gmra.mrb[2].mxu1 %vm144_vm0, %v478_v15 }
 0x193   :  { %1807 = vmatprep.mubr.msk.f32.mxu1 %vm2101_vm3, %v2102_v36  ;;  %1806 = vmatpush3.msk.msra.mxu1 %vm640_vm4, %v2446_v17 }
 0x194   :  { %1810 = vmatprep.subr.mxu1 %v2102_v36 }
 0x255   :  { %v548_v18 = vpop.f32.mrb[0].mxu1 }
 0x256   :  { %v1785_v19 = vpop.f32.mrb[1].mxu1  ;;  %v625_v20 = vmul.f32 0.001953125, %v548_v18 }
 0x258   :  { %v627_v24 = vmul.f32 %v625_v20, %v625_v20 }
 0x265   :  { %v621_v21 = vpop.f32.mrb[2].mxu1 }
 0x266   :  { %v626_v25 = vmul.f32 0.001953125, %v621_v21  ;;  %v1804_v28 = vpop.f32.mrb[3].mxu1 }
 0x268   :  { %v628_v30 = vsub.f32 %v626_v25, %v627_v24  ;;  %v833_v24 = vld [vmem:[%s2670_s2 + $0x10] sm:$0xff] }
 0x26a   :  { %v630_v32 = vadd.f32 1e-05, %v628_v30 }
 0x26c   :  { %2095 = vrsqrt.f32 %v630_v32 }
 0x276   :  { %v2096_v42 = vpop.eup %2095 }
 0x277   :  { %v632_v43 = vmul.f32 %v2096_v42, %v629_v34  ;;  %v835_v42 = vld [vmem:[%s2670_s2 + $0x20] sm:$0xff] }
 0x279   :  { %1808 = vmatmul.mubr.msk.f32.vlgmr.msra.gmra.mrb[4].mxu1 %vm636_vm5, %v632_v43  ;;  %v634_v52 = vmul.f32 %v632_v43, %v625_v20  ;;  %v836_v43 = vld [vmem:[%s2670_s2 + $0x28] sm:$0xff] }
 0x27a   :  { %1811 = vmatpush3.msk.msra.mxu1 %vm640_vm4, %v2446_v17  ;;  %1812 = vmatprep.mubr.msk.f32.mxu1 %vm2101_vm3, %v2102_v36  ;;  %v2025_v55 = vpack.c.bf16 %v836_v43, %v835_v42 }
 0x27b   :  { %v635_v53 = vsub.f32 %v633_v45, %v634_v52  ;;  %2002 = vmatprep.subr.bf16.mxu1 %v2001_v44 }
 0x27d   :  { %1813 = vmatmul.mubr.msk.f32.vlgmr.msra.gmra.mrb[6].mxu1 %vm636_vm5, %v635_v53 }
 0x27e   :  { %2004 = vmatpush3.bf16.msra.mxu1 %v2001_v44 }
 0x27f   :  { %2006 = vmatprep.subr.bf16.mxu1 %v2005_v54 }
 0x282   :  { %2008 = vmatpush3.bf16.msra.mxu1 %v2005_v54 }
 0x283   :  { %2010 = vmatprep.subr.bf16.mxu1 %v2009_v57 }
 0x286   :  { %2012 = vmatpush3.bf16.msra.mxu1 %v2009_v57 }
 0x287   :  { %2014 = vmatprep.subr.bf16.mxu1 %v2013_v62 }
 0x28a   :  { %2016 = vmatpush3.bf16.msra.mxu1 %v2013_v62 }
 0x28b   :  { %2018 = vmatprep.subr.bf16.mxu1 %v2017_v1 }
 0x34c   :  { %v710_v4 = vpop.f32.mrb[4].mxu1 }
 0x34d   :  { %v790_v5 = vrot.slane %v710_v4, %v2494_v3  ;;  %v1809_v6 = vpop.f32.mrb[5].mxu1  ;;  %v1567_v4 = vld [vmem:[%s2670_s2 + $0x80] sm:$0xff] }
 0x34f   :  { %v791_v7 = vmul.f32 %v790_v5, %v2407_v40  ;;  %v792_v8 = vmul.f32 %v2401_v37, %v790_v5  ;;  %v793_v9 = vmul.f32 %v790_v5, %v2417_v51  ;;  %v794_v11 = vmul.f32 %v2415_v49, %v790_v5  ;;  %v834_v40 = vld [vmem:[%s2670_s2 + $0x18] sm:$0xff]  ;;  %v1568_v5 = vld [vmem:[%s2670_s2 + $0x88] sm:$0xff] }
 0x350   :  { %v783_v14 = vpop.f32.mrb[6].mxu1  ;;  %v2021_v30 = vpack.c.bf16 %v834_v40, %v833_v24  ;;  %v2033_v6 = vpack.c.bf16 %v1568_v5, %v1567_v4 }
 0x351   :  { %v798_v15 = vrot.slane %v783_v14, %v2494_v3  ;;  %v1814_v18 = vpop.f32.mrb[7].mxu1  ;;  %v1571_v14 = vld [vmem:[%s2670_s2 + $0xa0] sm:$0xff] }
 0x353   :  { %v800_v19 = vadd.f32 %v798_v15, %v792_v8  ;;  %v799_v20 = vadd.f32 %v798_v15, %v791_v7  ;;  %v801_v21 = vadd.f32 %v798_v15, %v793_v9  ;;  %v802_v37 = vadd.f32 %v798_v15, %v794_v11  ;;  %v1570_v7 = vld [vmem:[%s2670_s2 + $0x98] sm:$0xff]  ;;  %v1572_v15 = vld [vmem:[%s2670_s2 + $0xa8] sm:$0xff] }
 0x354   :  { %v2037_v9 = vpack.c.bf16 %v1570_v7, %v1569_v41 }
 0x355   :  { %v804_v25 = vmax.f32 %v800_v19, 0.0  ;;  %v803_v51 = vmax.f32 %v799_v20, 0.0  ;;  %v805_v28 = vmax.f32 %v801_v21, 0.0  ;;  %v806_v49 = vmax.f32 %v802_v37, 0.0  ;;  %v1574_v20 = vld [vmem:[%s2670_s2 + $0xb8] sm:$0xff] }
 0x357   :  { %v808_v32 = vrot.slane %v804_v25, 7  ;;  %v807_v34 = vrot.slane %v803_v51, 7  ;;  %v819_v38 = vrot.slane %v803_v51, 1  ;;  %1831 = vmatprep.mubr.msk.f32.mxu1 %vm144_vm0, %v803_v51  ;;  %v809_v39 = vrot.slane %v805_v28, 7 }
 0x358   :  { %1832 = vmatmul.mubr.msk.f32.vlgmr.msra.gmra.mrb[8].mxu1 %vm144_vm0, %v804_v25  ;;  %v821_v44 = vrot.slane %v805_v28, 1  ;;  %v810_v45 = vrot.slane %v806_v49, 7  ;;  %v822_v46 = vrot.slane %v806_v49, 1  ;;  %v820_v50 = vrot.slane %v804_v25, 1 }
 0x359   :  { %v813_v52 = vsel %vm65_vm1, %v807_v34, %v808_v32  ;;  %2020 = vmatpush3.bf16.msra.mxu1 %v2017_v1  ;;  %1834 = vmatprep.mubr.msk.f32.mxu1 %vm144_vm0, %v805_v28  ;;  %v812_v53 = vsel %vm65_vm1, %v808_v32, %v809_v39  ;;  %v2029_v1 = vpack.c.bf16 %v838_v60, %v837_v59 }
 0x35a   :  { %2022 = vmatprep.subr.bf16.mxu1 %v2021_v30  ;;  %v814_v54 = vsel %vm65_vm1, %v810_v45, %v807_v34  ;;  %v811_v56 = vsel %vm65_vm1, %v809_v39, %v810_v45  ;;  %v824_v62 = vsel %vm98_vm2, %v820_v50, %v821_v44  ;;  %v825_v63 = vsel %vm98_vm2, %v819_v38, %v820_v50 }
 0x35b   :  { %v815_v57 = vmul.f32 %v814_v54, %v2280_v48  ;;  %v823_v0 = vsel %vm98_vm2, %v821_v44, %v822_v46  ;;  %v826_v48 = vsel %vm98_vm2, %v822_v46, %v819_v38  ;;  %v816_v8 = vmul.f32 %v813_v52, %v2300_v58 }
 0x35c   :  { %1835 = vmatmul.mubr.msk.f32.gmra.mrb[10].mxu1 %vm144_vm0, %v806_v49  ;;  %v817_v11 = vmul.f32 %v812_v53, %v2278_v47  ;;  %v818_v18 = vmul.f32 %v811_v56, %v2303_v61  ;;  %v2041_v58 = vpack.c.bf16 %v1572_v15, %v1571_v14  ;;  %v827_v19 = vmul.f32 %v825_v63, %v2315_v2  ;;  %v1573_v47 = vld [vmem:[%s2670_s2 + $0xb0] sm:$0xff]  ;;  %v1336_v14 = vld [vmem:[%s2673_s8] sm:$0x1] }
 0x35d   :  { %2024 = vmatpush3.bf16.msra.mxu1 %v2021_v30  ;;  %1853 = vmatprep.mubr.msk.f32.mxu1 %vm144_vm0, %v815_v57  ;;  %v2045_v21 = vpack.c.bf16 %v1574_v20, %v1573_v47  ;;  %v828_v61 = vmul.f32 %v824_v62, %v2329_v10  ;;  %v829_v2 = vmul.f32 %v823_v0, %v2333_v12 }
 0x35e   :  { %2026 = vmatprep.subr.bf16.mxu1 %v2025_v55  ;;  %v830_v24 = vmul.f32 %v826_v48, %v2338_v16 }
 0x361   :  { %2028 = vmatpush3.bf16.msra.mxu1 %v2025_v55 }
 0x362   :  { %2030 = vmatprep.subr.bf16.mxu1 %v2029_v1 }
 0x365   :  { %2032 = vmatpush3.bf16.msra.mxu1 %v2029_v1 }
 0x366   :  { %2034 = vmatprep.subr.bf16.mxu1 %v2033_v6 }
 0x368   :  { %1854 = vmatmul.mubr.msk.f32.vlgmr.msra.gmra.mrb[8].mxu1 %vm144_vm0, %v816_v8  ;;  %v1332_v8 = vld [vmem:[%s2672_s7] sm:$0x1] }
 0x369   :  { %1856 = vmatprep.mubr.msk.f32.mxu1 %vm144_vm0, %v817_v11  ;;  %2036 = vmatpush3.bf16.msra.mxu1 %v2033_v6 }
 0x36a   :  { %2038 = vmatprep.subr.bf16.mxu1 %v2037_v9 }
 0x36c   :  { %1857 = vmatmul.mubr.msk.f32.gmra.mrb[10].mxu1 %vm144_vm0, %v818_v18 }
 0x36d   :  { %2040 = vmatpush3.bf16.msra.mxu1 %v2037_v9  ;;  %1875 = vmatprep.mubr.msk.f32.mxu1 %vm144_vm0, %v827_v19 }
 0x36e   :  { %2042 = vmatprep.subr.bf16.mxu1 %v2041_v58 }
 0x371   :  { %2044 = vmatpush3.bf16.msra.mxu1 %v2041_v58 }
 0x372   :  { %2046 = vmatprep.subr.bf16.mxu1 %v2045_v21 }
 0x375   :  { %2048 = vmatpush3.bf16.msra.mxu1 %v2045_v21 }
 0x378   :  { %1876 = vmatmul.mubr.msk.f32.vlgmr.msra.gmra.mrb[8].mxu1 %vm144_vm0, %v828_v61 }
 0x379   :  { %1878 = vmatprep.mubr.msk.f32.mxu1 %vm144_vm0, %v829_v2 }
 0x37c   :  { %1879 = vmatmul.mubr.msk.f32.gmra.mrb[10].mxu1 %vm144_vm0, %v830_v24 }
 0x44b   :  { %v2580_v40 = vpop.f32.mrb[8].mxu1 }
 0x44c   :  { %v1153_v37 = vsel %vm144_vm0, %v2580_v40, 0.0  ;;  %v1166_v25 = vmul.f32 %v2580_v40, %v2580_v40  ;;  %v2586_v51 = vpop.f32.mrb[9].mxu1 }
 0x44d   :  { %v1152_v10 = vsel %vm144_vm0, %v2586_v51, 0.0  ;;  %v1165_v12 = vmul.f32 %v2586_v51, %v2586_v51 }
 0x44e   :  { %v1170_v16 = vsel %vm144_vm0, %v1166_v25, 0.0  ;;  %v1154_v28 = vadd.f32 %v1153_v37, %v1152_v10 }
 0x44f   :  { %v1169_v49 = vsel %vm144_vm0, %v1165_v12, 0.0  ;;  %v2594_v30 = vpop.f32.mrb[10].mxu1 }
 0x450   :  { %v1171_v32 = vadd.f32 %v1170_v16, %v1169_v49  ;;  %v2596_v34 = vpop.f32.mrb[11].mxu1  ;;  %v1168_v38 = vmul.f32 %v2594_v30, %v2594_v30  ;;  %v1157_v44 = vsel %vm144_vm0, %v2594_v30, 0.0 }
 0x451   :  { %v1155_v39 = vsel %vm144_vm0, %v2596_v34, 0.0  ;;  %v1167_v42 = vmul.f32 %v2596_v34, %v2596_v34 }
 0x452   :  { %v1156_v43 = vadd.f32 %v1155_v39, %v1154_v28  ;;  %v1174_v52 = vsel %vm144_vm0, %v1168_v38, 0.0 }
 0x453   :  { %v1172_v45 = vsel %vm144_vm0, %v1167_v42, 0.0 }
 0x454   :  { %v1158_v46 = vadd.f32 %v1157_v44, %v1156_v43  ;;  %v1173_v50 = vadd.f32 %v1172_v45, %v1171_v32 }
 0x456   :  { %v1159_v53 = vrot.slane %v1158_v46, 4  ;;  %v1175_v54 = vadd.f32 %v1174_v52, %v1173_v50 }
 0x458   :  { %v1160_v55 = vadd.f32 %v1159_v53, %v1158_v46  ;;  %v1176_v59 = vrot.slane %v1175_v54, 4 }
 0x45a   :  { %v1161_v56 = vrot.slane %v1160_v55, 2  ;;  %v1177_v63 = vadd.f32 %v1176_v59, %v1175_v54 }
 0x45c   :  { %v1162_v57 = vadd.f32 %v1161_v56, %v1160_v55  ;;  %v1178_v0 = vrot.slane %v1177_v63, 2 }
 0x45e   :  { %v1163_v60 = vrot.slane %v1162_v57, 1  ;;  %v1179_v48 = vadd.f32 %v1178_v0, %v1177_v63 }
 0x460   :  { %v1164_v62 = vadd.f32 %v1163_v60, %v1162_v57  ;;  %v1180_v1 = vrot.slane %v1179_v48, 1 }
 0x462   :  { %1898 = vmatmul.mubr.msk.f32.vlgmr.msra.gmra.mrb[4].mxu0 %vm144_vm0, %v1164_v62  ;;  %v1181_v4 = vadd.f32 %v1180_v1, %v1179_v48 }
 0x463   :  { %2063 = vmatpush3.bf16.msra.mxu0 %v2353_v22  ;;  %1916 = vmatprep.mubr.msk.f32.mxu0 %vm2101_vm3, %v2102_v36 }
 0x464   :  { %2064 = vmatprep.subr.bf16.mxu0 %v2100_v23 }
 0x467   :  { %2066 = vmatpush3.bf16.msra.mxu0 %v2367_v26 }
 0x468   :  { %2067 = vmatprep.subr.bf16.mxu0 %v2100_v23 }
 0x46b   :  { %2069 = vmatpush3.bf16.msra.mxu0 %v2379_v31 }
 0x46c   :  { %2070 = vmatprep.subr.bf16.mxu0 %v2100_v23 }
 0x46f   :  { %2072 = vmatpush3.bf16.msra.mxu0 %v2391_v35 }
 0x470   :  { %1919 = vmatprep.subr.mxu0 %v2102_v36 }
 0x472   :  { %1917 = vmatmul.mubr.msk.f32.vlgmr.msra.gmra.mrb[6].mxu0 %vm144_vm0, %v1181_v4 }
 0x473   :  { %1920 = vmatpush3.msk.msra.mxu0 %vm640_vm4, %v2446_v17  ;;  %1921 = vmatprep.mubr.msk.f32.mxu0 %vm2101_vm3, %v2102_v36 }
 0x474   :  { %1924 = vmatprep.subr.mxu0 %v2102_v36 }
 0x535   :  { %v1251_v22 = vpop.f32.mrb[4].mxu0 }
 0x536   :  { %v1899_v26 = vpop.f32.mrb[5].mxu0  ;;  %v1328_v31 = vmul.f32 0.001953125, %v1251_v22 }
 0x538   :  { %v1330_v23 = vmul.f32 %v1328_v31, %v1328_v31 }
 0x545   :  { %v1324_v5 = vpop.f32.mrb[6].mxu0 }
 0x546   :  { %v1329_v6 = vmul.f32 0.001953125, %v1324_v5  ;;  %v1918_v35 = vpop.f32.mrb[7].mxu0 }
 0x548   :  { %v1331_v41 = vsub.f32 %v1329_v6, %v1330_v23 }
 0x54a   :  { %v1333_v7 = vadd.f32 1e-05, %v1331_v41 }
 0x54c   :  { %2097 = vrsqrt.f32 %v1333_v7 }
 0x556   :  { %v2098_v9 = vpop.eup %2097 }
 0x557   :  { %v1335_v11 = vmul.f32 %v2098_v9, %v1332_v8 }
 0x559   :  { %1922 = vmatmul.mubr.msk.f32.vlgmr.msra.gmra.mrb[8].mxu0 %vm636_vm5, %v1335_v11  ;;  %v1337_v15 = vmul.f32 %v1335_v11, %v1328_v31 }
 0x55a   :  { %1925 = vmatpush3.msk.msra.mxu0 %vm640_vm4, %v2446_v17  ;;  %1926 = vmatprep.mubr.msk.f32.mxu0 %vm2101_vm3, %v2102_v36 }
 0x55b   :  { %v1338_v18 = vsub.f32 %v1336_v14, %v1337_v15 }
 0x55d   :  { %1927 = vmatmul.mubr.msk.f32.vlgmr.msra.gmra.mrb[10].mxu0 %vm636_vm5, %v1338_v18 }
 0x62c   :  { %v1408_v58 = vpop.f32.mrb[8].mxu0 }
 0x62d   :  { %v1488_v19 = vrot.slane %v1408_v58, %v2494_v3  ;;  %v1923_v47 = vpop.f32.mrb[9].mxu0 }
 0x62f   :  { %v1489_v20 = vmul.f32 %v1488_v19, %v2586_v51  ;;  %v1490_v21 = vmul.f32 %v2580_v40, %v1488_v19  ;;  %v1491_v61 = vmul.f32 %v1488_v19, %v2596_v34  ;;  %v1492_v2 = vmul.f32 %v2594_v30, %v1488_v19 }
 0x630   :  { %v1481_v24 = vpop.f32.mrb[10].mxu0 }
 0x631   :  { %v1496_v17 = vrot.slane %v1481_v24, %v2494_v3  ;;  %v1928_v37 = vpop.f32.mrb[11].mxu0 }
 0x633   :  { %v1497_v36 = vadd.f32 %v1496_v17, %v1489_v20  ;;  %v1498_v25 = vadd.f32 %v1496_v17, %v1490_v21  ;;  %v1499_v10 = vadd.f32 %v1496_v17, %v1491_v61  ;;  %v1500_v12 = vadd.f32 %v1496_v17, %v1492_v2 }
 0x635   :  { %v1501_v16 = vadd.f32 %v1497_v36, %v2196_v13  ;;  %v1502_v28 = vadd.f32 %v1498_v25, %v2233_v27  ;;  %v1503_v51 = vadd.f32 %v1499_v10, %v2238_v29  ;;  %v1504_v40 = vadd.f32 %v1500_v12, %v2253_v33 }
 0x637   :  { %v1505_v49 = vmax.f32 %v1501_v16, 0.0  ;;  %v1506_v32 = vmax.f32 %v1502_v28, 0.0  ;;  %v1507_v34 = vmax.f32 %v1503_v51, 0.0  ;;  %v1508_v30 = vmax.f32 %v1504_v40, 0.0 }
 0x639   :  { %1509 = vst.msk [vmem:[%s2674_s11] sm:$0xff] %vm144_vm0, %v1505_v49  ;;  %1510 = vst.msk [vmem:[%s2674_s11 + $0x8] sm:$0xff] %vm144_vm0, %v1506_v32 }
 0x63a   :  { %1511 = vst.msk [vmem:[%s2674_s11 + $0x10] sm:$0xff] %vm144_vm0, %v1507_v34  ;;  %1512 = vst.msk [vmem:[%s2674_s11 + $0x18] sm:$0xff] %vm144_vm0, %v1508_v30 }

</bundles_post_ra>
